<compile_context>
chip_gen: v6e
topology: v6e:2x2x1
jax: 0.10.0
libtpu: 0.0.40
codegen_flags: <defaults>
</compile_context>

<pallas_src>
import functools

import jax
import jax.numpy as jnp
from jax.experimental import pallas as pl
from jax.experimental.pallas import tpu as pltpu

LANES = 128
CHUNK = 64                  # rows per inner accumulation step; multiple of the
                            # sublane packing of every dtype (f32:8, bf16:16, i8:32)
DEFAULT_BLOCK_ROWS = 2048   # (2048, 128) f32 = 1 MiB per input per pipeline buffer
                            # (for v7x, pass block_rows=4096..8192 to re-amortize
                            # the ~0.35 us per-grid-step overhead vs 3.2 TB/s HBM)


def _round_up(x, m):
    return ((x + m - 1) // m) * m


def _make_dice_partials_kernel(blk, chunk, unroll):
    """Per-block kernel: writes [sum(p*t); sum(p)+sum(t)] lane/sublane-wise partials."""
    n_chunks = blk // chunk
    g8 = chunk // 8

    def kernel(p_ref, t_ref, out_ref):
        def body(g, carry):
            inter_acc, denom_acc = carry
            off = pl.multiple_of(g * chunk, chunk)
            # Load a small chunk in the native dtype and upcast in-register;
            # temporaries are ~8-16 vregs, never a full-block VMEM slab.
            p = p_ref[pl.ds(off, chunk), :].astype(jnp.float32)
            t = t_ref[pl.ds(off, chunk), :].astype(jnp.float32)
            # (chunk,128) -> (chunk/8,8,128) is a tile-aligned view; reducing the
            # leading axis is pure VPU vadds (no XLU / cross-lane work in the loop).
            inter_acc = inter_acc + jnp.sum((p * t).reshape(g8, 8, LANES), axis=0)
            denom_acc = denom_acc + jnp.sum((p + t).reshape(g8, 8, LANES), axis=0)
            return inter_acc, denom_acc

        zeros = jnp.zeros((8, LANES), jnp.float32)
        inter_acc, denom_acc = jax.lax.fori_loop(
            0, n_chunks, body, (zeros, zeros), unroll=unroll)

        # Single fused output block per grid step: [intersection; denominator].
        out_ref[0, 0, :, :] = inter_acc
        out_ref[0, 1, :, :] = denom_acc

    return kernel


@functools.partial(jax.jit, static_argnames=("block_rows",))
def dice_loss_pallas(preds, targets, smooth=1.0, *, block_rows=DEFAULT_BLOCK_ROWS):
    # torch: preds.view(-1), targets.view(-1).  Reshape of a contiguous array is
    # free; no dtype change here — narrow dtypes (bf16 preds, int8 targets)
    # stream as-is and are upcast per-chunk inside the kernel.
    p = preds.reshape(-1)
    t = targets.reshape(-1)
    if p.dtype == jnp.bool_:
        p = p.astype(jnp.int8)
    if t.dtype == jnp.bool_:
        t = t.astype(jnp.int8)
    n = p.shape[0]

    # Lane alignment: only when the flat length is not a multiple of 128
    # (pads <=127 neutral zeros).
    rem = n % LANES
    if rem:
        p = jnp.pad(p, (0, LANES - rem))
        t = jnp.pad(t, (0, LANES - rem))
    rows = p.shape[0] // LANES
    p2d = p.reshape(rows, LANES)
    t2d = t.reshape(rows, LANES)

    blk_large = _round_up(block_rows, CHUNK)
    if rows >= blk_large:
        # Large input: grid over full blocks only -> mask-free kernel; the
        # (< blk)-row tail is handled by the tiny JAX epilogue below.
        blk = blk_large
        n_blocks = rows // blk
        tail_start = n_blocks * blk
    else:
        # Small input: one block, zero-padded up to a CHUNK multiple in the
        # wrapper (cheap at this size; zeros are neutral), single kernel path.
        blk = _round_up(max(rows, 1), CHUNK)
        pad_rows = blk - rows
        if pad_rows:
            p2d = jnp.pad(p2d, ((0, pad_rows), (0, 0)))
            t2d = jnp.pad(t2d, ((0, pad_rows), (0, 0)))
        n_blocks = 1
        tail_start = None

    n_chunks = blk // CHUNK
    unroll = True if n_chunks <= 32 else 8
    kernel = _make_dice_partials_kernel(blk, CHUNK, unroll)

    # Pipeline VMEM: 2 buffers per input in the native dtype.  Only raise the
    # scoped limit when a big (v7x-tuned) block actually needs it.
    vmem_need = 2 * blk * LANES * (p2d.dtype.itemsize + t2d.dtype.itemsize)
    cp_kwargs = dict(dimension_semantics=("parallel",))
    if vmem_need > (12 << 20):
        cp_kwargs["vmem_limit_bytes"] = int(min(vmem_need + (8 << 20), 60 << 20))

    parts = pl.pallas_call(
        kernel,
        out_shape=jax.ShapeDtypeStruct((n_blocks, 2, 8, LANES), jnp.float32),
        grid_spec=pltpu.PrefetchScalarGridSpec(
            num_scalar_prefetch=0,
            grid=(n_blocks,),
            in_specs=[
                pl.BlockSpec((blk, LANES), lambda i: (i, 0)),
                pl.BlockSpec((blk, LANES), lambda i: (i, 0)),
            ],
            out_specs=pl.BlockSpec((1, 2, 8, LANES), lambda i: (i, 0, 0, 0)),
        ),
        compiler_params=pltpu.CompilerParams(**cp_kwargs),
    )(p2d, t2d)

    # Tiny epilogue: cross-lane finish over a few KiB of partials + dice formula.
    intersection = jnp.sum(parts[:, 0])
    denom = jnp.sum(parts[:, 1])

    if tail_start is not None and tail_start < rows:
        # Large-input ragged tail (< 1 block): handled here so the kernel never
        # pays an iota/compare/select per step.
        pt = p2d[tail_start:].astype(jnp.float32)
        tt = t2d[tail_start:].astype(jnp.float32)
        intersection = intersection + jnp.sum(pt * tt)
        denom = denom + jnp.sum(pt) + jnp.sum(tt)

    dice_coef = (2.0 * intersection + smooth) / (denom + smooth)
    return 1.0 - dice_coef


def dice_loss_ref(preds, targets, smooth=1.0):
    p = preds.reshape(-1).astype(jnp.float32)
    t = targets.reshape(-1).astype(jnp.float32)
    inter = jnp.sum(p * t)
    dice = (2.0 * inter + smooth) / (jnp.sum(p) + jnp.sum(t) + smooth)
    return 1.0 - dice


if __name__ == "__main__":
    key = jax.random.PRNGKey(0)
    k1, k2, k3, k4, k5, k6 = jax.random.split(key, 6)

    # 1) f32 preds / f32 targets at a small segmentation-like NCHW shape.
    B, C, H, W = 2, 4, 16, 16
    preds = jax.nn.sigmoid(jax.random.normal(k1, (B, C, H, W), jnp.float32))
    targets = (jax.random.uniform(k2, (B, C, H, W)) > 0.5).astype(jnp.float32)
    loss = jax.block_until_ready(dice_loss_pallas(preds, targets))
    ref = dice_loss_ref(preds, targets)
    assert jnp.allclose(loss, ref, atol=1e-5, rtol=1e-5), (loss, ref)

    # 2) Lane-ragged flat length (2*3*13*13 = 1014, not a multiple of 128).
    preds2 = jax.nn.sigmoid(jax.random.normal(k3, (2, 3, 13, 13), jnp.float32))
    targets2 = (jax.random.uniform(k4, (2, 3, 13, 13)) > 0.5).astype(jnp.float32)
    loss2 = jax.block_until_ready(dice_loss_pallas(preds2, targets2))
    ref2 = dice_loss_ref(preds2, targets2)
    assert jnp.allclose(loss2, ref2, atol=1e-5, rtol=1e-5), (loss2, ref2)

    # 3) Narrow-dtype + multi-block + JAX-tail path: bf16 preds, int8 targets,
    #    small block_rows so this modest shape takes the tiled (grid>1) path.
    preds3 = jax.nn.sigmoid(
        jax.random.normal(k5, (2, 4, 72, 72), jnp.float32)).astype(jnp.bfloat16)
    targets3 = (jax.random.uniform(k6, (2, 4, 72, 72)) > 0.5).astype(jnp.int8)
    loss3 = jax.block_until_ready(dice_loss_pallas(preds3, targets3, block_rows=128))
    ref3 = dice_loss_ref(preds3, targets3)
    assert jnp.allclose(loss3, ref3, atol=1e-4, rtol=1e-4), (loss3, ref3)

    print("KERNEL_OK")
</pallas_src>

<mosaic_0001>
module attributes {stable_mosaic.version = 11 : i64} {
  func.func @kernel(%arg0: i32, %arg1: memref<64x128xf32, #tpu.memory_space<vmem>>, %arg2: memref<64x128xf32, #tpu.memory_space<vmem>>, %arg3: memref<1x2x8x128xf32, #tpu.memory_space<vmem>>) attributes {dimension_semantics = [#tpu.dimension_semantics<parallel>], iteration_bounds = array<i64: 1>, scalar_prefetch = 0 : i64, scratch_operands = 0 : i64, tpu.core_type = #tpu.core_type<tc>, window_params = [{transform_indices = @transform_0, window_bounds = array<i64: 64, 128>}, {transform_indices = @transform_1, window_bounds = array<i64: 64, 128>}, {transform_indices = @transform_2, window_bounds = array<i64: 1, 2, 8, 128>}]} {
    %cst = arith.constant 0.000000e+00 : f32
    %0 = vector.broadcast %cst : f32 to vector<8x128xf32>
    %c0_i32 = arith.constant 0 : i32
    %c64_i32 = arith.constant 64 : i32
    %1 = arith.muli %c0_i32, %c64_i32 : i32
    %2 = tpu.assume_multiple %1, 64 : i32
    %3 = arith.index_cast %2 : i32 to index
    %c0 = arith.constant 0 : index
    %4 = vector.load %arg1[%3, %c0] : memref<64x128xf32, #tpu.memory_space<vmem>>, vector<64x128xf32>
    %5 = arith.index_cast %2 : i32 to index
    %c0_0 = arith.constant 0 : index
    %6 = vector.load %arg2[%5, %c0_0] : memref<64x128xf32, #tpu.memory_space<vmem>>, vector<64x128xf32>
    %7 = arith.mulf %4, %6 : vector<64x128xf32>
    %8 = vector.shape_cast %7 : vector<64x128xf32> to vector<8x8x128xf32>
    %cst_1 = arith.constant dense<0.000000e+00> : vector<8x128xf32>
    %9 = vector.multi_reduction <add>, %8, %cst_1 [0] : vector<8x8x128xf32> to vector<8x128xf32>
    %10 = arith.addf %0, %9 : vector<8x128xf32>
    %11 = arith.addf %4, %6 : vector<64x128xf32>
    %12 = vector.shape_cast %11 : vector<64x128xf32> to vector<8x8x128xf32>
    %cst_2 = arith.constant dense<0.000000e+00> : vector<8x128xf32>
    %13 = vector.multi_reduction <add>, %12, %cst_2 [0] : vector<8x8x128xf32> to vector<8x128xf32>
    %14 = arith.addf %0, %13 : vector<8x128xf32>
    %c1_i32 = arith.constant 1 : i32
    %c0_3 = arith.constant 0 : index
    %c0_4 = arith.constant 0 : index
    %c0_5 = arith.constant 0 : index
    %c0_6 = arith.constant 0 : index
    %15 = vector.load %arg3[%c0_3, %c0_4, %c0_5, %c0_6] : memref<1x2x8x128xf32, #tpu.memory_space<vmem>>, vector<1x1x8x128xf32>
    %16 = vector.shape_cast %15 : vector<1x1x8x128xf32> to vector<8x128xf32>
    %17 = vector.shape_cast %10 : vector<8x128xf32> to vector<1x1x8x128xf32>
    tpu.vector_store %arg3[%c0_3, %c0_4, %c0_5, %c0_6], %17 {strides = array<i32>} : memref<1x2x8x128xf32, #tpu.memory_space<vmem>>, vector<1x1x8x128xf32>,
    %c0_7 = arith.constant 0 : index
    %c1 = arith.constant 1 : index
    %c0_8 = arith.constant 0 : index
    %c0_9 = arith.constant 0 : index
    %18 = vector.load %arg3[%c0_7, %c1, %c0_8, %c0_9] : memref<1x2x8x128xf32, #tpu.memory_space<vmem>>, vector<1x1x8x128xf32>
    %19 = vector.shape_cast %18 : vector<1x1x8x128xf32> to vector<8x128xf32>
    %20 = vector.shape_cast %14 : vector<8x128xf32> to vector<1x1x8x128xf32>
    tpu.vector_store %arg3[%c0_7, %c1, %c0_8, %c0_9], %20 {strides = array<i32>} : memref<1x2x8x128xf32, #tpu.memory_space<vmem>>, vector<1x1x8x128xf32>,
    return
  }
  func.func @transform_0(%arg0: i32) -> (i32, i32) {
    %c0_i32 = arith.constant 0 : i32
    %c0_i32_0 = arith.constant 0 : i32
    return %arg0, %c0_i32 : i32, i32
  }
  func.func @transform_1(%arg0: i32) -> (i32, i32) {
    %c0_i32 = arith.constant 0 : i32
    %c0_i32_0 = arith.constant 0 : i32
    return %arg0, %c0_i32 : i32, i32
  }
  func.func @transform_2(%arg0: i32) -> (i32, i32, i32, i32) {
    %c0_i32 = arith.constant 0 : i32
    %c0_i32_0 = arith.constant 0 : i32
    %c0_i32_1 = arith.constant 0 : i32
    %c0_i32_2 = arith.constant 0 : i32
    return %arg0, %c0_i32, %c0_i32_0, %c0_i32_1 : i32, i32, i32, i32
  }
}

</mosaic_0001>

<bundles_post_ra>
// kernel: dice_loss_pallas.1
= control target key start
LH: loop header
LB: loop body
LE: loop exit
PB: predicated region body
PF: predicated region fallthrough
CT: control target
= control target key end

     0   :  { %s136_s0 = inlined_call_operand.vmem [shape: f32[64,128], index: 0, kind: input, shape index: {}]   ;;  %s137_s1 = inlined_call_operand.vmem [shape: f32[64,128], index: 1, kind: input, shape index: {}]   ;;  %s138_s2 = inlined_call_operand.vmem [shape: f32[1,2,8,128], index: 2, kind: output, shape index: {}]  }
   0x1   :  { %v11_v0 = vld [vmem:[%s136_s0] sm:$0xff]  ;;  %v12_v1 = vld [vmem:[%s136_s0 + $0x8] sm:$0xff]  ;;  %v13_v2 = vld [vmem:[%s136_s0 + $0x10] sm:$0xff] }
   0x2   :  { %v14_v3 = vld [vmem:[%s136_s0 + $0x18] sm:$0xff]  ;;  %v19_v4 = vld [vmem:[%s137_s1] sm:$0xff]  ;;  %v20_v5 = vld [vmem:[%s137_s1 + $0x8] sm:$0xff] }
   0x3   :  { %v21_v6 = vld [vmem:[%s137_s1 + $0x10] sm:$0xff]  ;;  %v22_v7 = vld [vmem:[%s137_s1 + $0x18] sm:$0xff]  ;;  %v27_v8 = vmul.f32 %v19_v4, %v11_v0  ;;  %v43_v9 = vadd.f32 %v19_v4, %v11_v0  ;;  %v28_v10 = vmul.f32 %v20_v5, %v12_v1  ;;  %v44_v12 = vadd.f32 %v20_v5, %v12_v1  ;;  %v15_v13 = vld [vmem:[%s136_s0 + $0x20] sm:$0xff] }
   0x4   :  { %v29_v11 = vmul.f32 %v21_v6, %v13_v2  ;;  %v23_v14 = vld [vmem:[%s137_s1 + $0x20] sm:$0xff]  ;;  %v45_v15 = vadd.f32 %v21_v6, %v13_v2  ;;  %v30_v16 = vmul.f32 %v22_v7, %v14_v3  ;;  %v16_v18 = vld [vmem:[%s136_s0 + $0x28] sm:$0xff]  ;;  %v46_v20 = vadd.f32 %v22_v7, %v14_v3  ;;  %v17_v24 = vld [vmem:[%s136_s0 + $0x30] sm:$0xff] }
   0x5   :  { %v35_v17 = vadd.f32 %v28_v10, %v27_v8  ;;  %v24_v19 = vld [vmem:[%s137_s1 + $0x28] sm:$0xff]  ;;  %v51_v21 = vadd.f32 %v44_v12, %v43_v9  ;;  %v31_v22 = vmul.f32 %v23_v14, %v15_v13  ;;  %v25_v25 = vld [vmem:[%s137_s1 + $0x30] sm:$0xff]  ;;  %v47_v26 = vadd.f32 %v23_v14, %v15_v13  ;;  %v18_v30 = vld [vmem:[%s136_s0 + $0x38] sm:$0xff] }
   0x6   :  { %v32_v28 = vmul.f32 %v24_v19, %v16_v18  ;;  %v26_v31 = vld [vmem:[%s137_s1 + $0x38] sm:$0xff]  ;;  %v48_v32 = vadd.f32 %v24_v19, %v16_v18  ;;  %v33_v34 = vmul.f32 %v25_v25, %v17_v24  ;;  %v49_v36 = vadd.f32 %v25_v25, %v17_v24 }
   0x7   :  { %v36_v23 = vadd.f32 %v35_v17, %v29_v11  ;;  %v52_v27 = vadd.f32 %v51_v21, %v45_v15  ;;  %v34_v38 = vmul.f32 %v26_v31, %v18_v30  ;;  %v50_v40 = vadd.f32 %v26_v31, %v18_v30 }
   0x9   :  { %v37_v29 = vadd.f32 %v36_v23, %v30_v16  ;;  %v53_v33 = vadd.f32 %v52_v27, %v46_v20 }
   0xb   :  { %v38_v35 = vadd.f32 %v37_v29, %v31_v22  ;;  %v54_v37 = vadd.f32 %v53_v33, %v47_v26 }
   0xd   :  { %v39_v39 = vadd.f32 %v38_v35, %v32_v28  ;;  %v55_v41 = vadd.f32 %v54_v37, %v48_v32 }
   0xf   :  { %v40_v42 = vadd.f32 %v39_v39, %v33_v34  ;;  %v56_v43 = vadd.f32 %v55_v41, %v49_v36 }
  0x11   :  { %v41_v44 = vadd.f32 %v40_v42, %v34_v38  ;;  %v57_v45 = vadd.f32 %v56_v43, %v50_v40 }
  0x13   :  { %59 = vst [vmem:[%s138_s2] sm:$0xff] %v41_v44  ;;  %66 = vst [vmem:[%s138_s2 + $0x8] sm:$0xff] %v57_v45 }

</bundles_post_ra>
